<compile_context>
chip_gen: v6e
topology: v6e:2x2x1
jax: 0.10.0
libtpu: 0.0.40
codegen_flags: <defaults>
</compile_context>

<pallas_src>
import jax
import jax.numpy as jnp
from jax.experimental import pallas as pl
from jax.experimental.pallas import tpu as pltpu


def _normalize_kernel(x_ref, p_ref, out_ref):
    # x_ref / out_ref : (rb, cb) tile of the flattened (N*C, H*W) image.
    # p_ref           : (rb, 2) f32 per-row params: [:, 0] = mean, [:, 1] = 1/std.
    mean = p_ref[:, 0:1]       # (rb, 1), lane-broadcast against the tile
    inv_std = p_ref[:, 1:2]    # (rb, 1)
    y = (x_ref[...] - mean) * inv_std   # promoted to f32 regardless of input dtype
    out_ref[...] = y.astype(out_ref.dtype)


def _round_up(x, m):
    return ((x + m - 1) // m) * m


def normalization_forward(img, mean, std, *, row_target=256, col_target=2048):
    """img: (N, C, H, W); mean/std: (C,) -> (img - mean[:,None,None]) / std[:,None,None]."""
    N, C, H, W = img.shape
    dtype = img.dtype
    itemsize = jnp.dtype(dtype).itemsize
    R, L = N * C, H * W

    # Per-row (row = one (n, c) plane) params, kept in f32 for precision.
    mean32 = jnp.asarray(mean, jnp.float32)
    inv_std32 = 1.0 / jnp.asarray(std, jnp.float32)
    params = jnp.stack([jnp.tile(mean32, N), jnp.tile(inv_std32, N)], axis=1)  # (R, 2)

    # dtype-aware sublane unit: 8 (f32) / 16 (bf16) / 32 (int8, fp8).
    sublane = max(8, 32 // itemsize)
    row_target = _round_up(row_target, sublane)
    col_target = _round_up(col_target, 128)

    rb = min(_round_up(R, sublane), row_target)   # sublane-aligned row block
    cb = min(_round_up(L, 128), col_target)       # lane-dense column block

    grid_r = pl.cdiv(R, rb)
    grid_c = pl.cdiv(L, cb)

    # Give multi-TensorCore chips (v7x) at least two blocks to shard across
    # cores, but only when the array is big enough for it to matter.
    if grid_r * grid_c < 2 and R * L * itemsize >= (1 << 20):
        if R > sublane:
            rb = _round_up(pl.cdiv(R, 2), sublane)
        elif L > 128:
            cb = _round_up(pl.cdiv(L, 2), 128)
        grid_r = pl.cdiv(R, rb)
        grid_c = pl.cdiv(L, cb)

    # Free reshape to a lane-dense 2-D view; no padding, no output slice.
    x2d = img.reshape(R, L)

    cost = pl.CostEstimate(
        flops=2 * R * L,
        transcendentals=0,
        bytes_accessed=2 * R * L * itemsize + R * 2 * 4,
    )

    out2d = pl.pallas_call(
        _normalize_kernel,
        out_shape=jax.ShapeDtypeStruct((R, L), dtype),
        grid_spec=pltpu.PrefetchScalarGridSpec(
            num_scalar_prefetch=0,
            grid=(grid_r, grid_c),
            in_specs=[
                pl.BlockSpec((rb, cb), lambda i, j: (i, j)),
                # Fused (mean, 1/std) slab: constant along the inner grid axis,
                # so it is only re-fetched when the row block changes.
                pl.BlockSpec((rb, 2), lambda i, j: (i, 0)),
            ],
            out_specs=pl.BlockSpec((rb, cb), lambda i, j: (i, j)),
        ),
        compiler_params=pltpu.CompilerParams(
            # Pure streaming elementwise op: both grid axes independent, so
            # multi-TC chips (v7x) can shard the loop across cores.
            dimension_semantics=("parallel", "parallel"),
        ),
        cost_estimate=cost,
    )(x2d, params)

    return out2d.reshape(N, C, H, W)


if __name__ == "__main__":
    key = jax.random.PRNGKey(0)
    N, C, H, W = 2, 3, 16, 16  # RGB images, matching the module's 3-channel stats

    img = jax.random.uniform(key, (N, C, H, W), dtype=jnp.float32)
    mean = jnp.array([0.485, 0.456, 0.406], dtype=jnp.float32)
    std = jnp.array([0.229, 0.224, 0.225], dtype=jnp.float32)

    out = normalization_forward(img, mean, std)
    out = jax.block_until_ready(out)

    # Reference check in plain JAX (same semantics as the PyTorch forward).
    # (x - mean) * (1/std) can differ from true division by ~1 ulp, hence the
    # slightly relaxed tolerance.
    ref = (img - mean.reshape(-1, 1, 1)) / std.reshape(-1, 1, 1)
    assert out.shape == (N, C, H, W)
    assert jnp.allclose(out, ref, atol=1e-5, rtol=1e-5)

    print("KERNEL_OK")
</pallas_src>

<mosaic_0001>
module attributes {stable_mosaic.version = 11 : i64} {
  func.func @_normalize_kernel(%arg0: i32, %arg1: i32, %arg2: memref<8x256xf32, #tpu.memory_space<vmem>>, %arg3: memref<8x2xf32, #tpu.memory_space<vmem>>, %arg4: memref<8x256xf32, #tpu.memory_space<vmem>>) attributes {dimension_semantics = [#tpu.dimension_semantics<parallel>, #tpu.dimension_semantics<parallel>], iteration_bounds = array<i64: 1, 1>, scalar_prefetch = 0 : i64, scratch_operands = 0 : i64, tpu.core_type = #tpu.core_type<tc>, window_params = [{transform_indices = @transform_0, window_bounds = array<i64: 8, 256>}, {transform_indices = @transform_1, window_bounds = array<i64: 8, 2>}, {transform_indices = @transform_2, window_bounds = array<i64: 8, 256>}]} {
    %c0 = arith.constant 0 : index
    %c0_0 = arith.constant 0 : index
    %0 = vector.load %arg3[%c0, %c0_0] : memref<8x2xf32, #tpu.memory_space<vmem>>, vector<8x1xf32>
    %c0_1 = arith.constant 0 : index
    %c1 = arith.constant 1 : index
    %1 = vector.load %arg3[%c0_1, %c1] : memref<8x2xf32, #tpu.memory_space<vmem>>, vector<8x1xf32>
    %c0_2 = arith.constant 0 : index
    %c0_3 = arith.constant 0 : index
    %2 = vector.load %arg2[%c0_2, %c0_3] : memref<8x256xf32, #tpu.memory_space<vmem>>, vector<8x256xf32>
    %3 = vector.broadcast %0 : vector<8x1xf32> to vector<8x256xf32>
    %4 = arith.subf %2, %3 : vector<8x256xf32>
    %5 = vector.broadcast %1 : vector<8x1xf32> to vector<8x256xf32>
    %6 = arith.mulf %4, %5 : vector<8x256xf32>
    %c0_4 = arith.constant 0 : index
    %c0_5 = arith.constant 0 : index
    %7 = vector.load %arg4[%c0_4, %c0_5] : memref<8x256xf32, #tpu.memory_space<vmem>>, vector<8x256xf32>
    tpu.vector_store %arg4[%c0_4, %c0_5], %6 {strides = array<i32>} : memref<8x256xf32, #tpu.memory_space<vmem>>, vector<8x256xf32>,
    return
  }
  func.func @transform_0(%arg0: i32, %arg1: i32) -> (i32, i32) {
    %c0_i32 = arith.constant 0 : i32
    return %arg0, %arg1 : i32, i32
  }
  func.func @transform_1(%arg0: i32, %arg1: i32) -> (i32, i32) {
    %c0_i32 = arith.constant 0 : i32
    %c0_i32_0 = arith.constant 0 : i32
    return %arg0, %c0_i32 : i32, i32
  }
  func.func @transform_2(%arg0: i32, %arg1: i32) -> (i32, i32) {
    %c0_i32 = arith.constant 0 : i32
    return %arg0, %arg1 : i32, i32
  }
}

</mosaic_0001>

<bundles_post_ra>
// kernel: tpu_custom_call.1
= control target key start
LH: loop header
LB: loop body
LE: loop exit
PB: predicated region body
PF: predicated region fallthrough
CT: control target
= control target key end

     0   :  { %7 = vsyncpa [#allocation3], 0  ;;  %s135_s0 = inlined_call_operand.hbm [shape: f32[6,256], index: 0, kind: input, shape index: {}]   ;;  %s136_s1 = inlined_call_operand.vmem [shape: f32[6,2], index: 1, kind: input, shape index: {}]   ;;  %s137_s2 = inlined_call_operand.hbm [shape: f32[6,256], index: 2, kind: output, shape index: {}]  }
   0x1   :  { %8 = vsyncpa [#allocation4], 0  ;;  %s107_s9 = smov [#allocation2]  }
   0x2   :  { %s15_s10 = sshll.u32 %s107_s9, 4  ;;  %s16_s10 = int_to_ptr.vmem [resolvable:$true] %s15_s10 }
   0x3   :  { %s71_s11 = scalar_lea.vmem %s16_s10, 256  ;;  %p76_p1 = scmp.lt.s32.totalorder %s16_s10, %s16_s10 }
   0x4   :  { %p72_p0 = scmp.ne.s32.totalorder %s16_s10, %s71_s11  ;;  %p77_p2 = scmp.lt.s32.totalorder %s71_s11, %s71_s11 }
   0x6   :  { %p78_p3 = por %p77_p2, %p76_p1 }
   0x8   :  { %p79_p4 = pnand %p78_p3, %p72_p0 }
   0xa   :  { %82 = shalt.err (!%p79_p4)
}
   0xb   :  { %18 = dma.hbm_to_vmem [thread:$0]  %s135_s0, 256, %s16_s10, [#allocation3]  }
   0xc   :  { %103 = dma.done.wait [#allocation3], 256  }
   0xd   :  { %104 = vsyncadd [#allocation3], 4294967040  ;;  %v108_v0 = vmov 0   ;;  %v24_v1 = vld [vmem:[%s136_s1] sm:$0xff]  ;;  %v109_v2 = vmov 1   ;;  %v26_v5 = vld [vmem:[#allocation2 + $0x8] sm:$0xff] }
   0xe   :  { %61 = vset.pattern.permute.xlu0 %v108_v0  ;;  %v25_v4 = vld [vmem:[#allocation2] sm:$0xff]  ;;  %s110_s16 = smov [#allocation5]  }
   0xf   :  { %29 = vperm.xlu0 %61, %v24_v1   ;;  %s48_s17 = sshll.u32 %s110_s16, 4  ;;  %s49_s17 = int_to_ptr.vmem [resolvable:$true] %s48_s17 }
  0x10   :  { %s83_s0 = scalar_lea.vmem %s49_s17, 256  ;;  %p88_p6 = scmp.lt.s32.totalorder %s49_s17, %s49_s17 }
  0x11   :  { %p84_p5 = scmp.ne.s32.totalorder %s49_s17, %s83_s0  ;;  %p89_p7 = scmp.lt.s32.totalorder %s83_s0, %s83_s0 }
  0x13   :  { %62 = vset.pattern.permute.xlu0 %v109_v2  ;;  %p90_p8 = por %p89_p7, %p88_p6 }
  0x14   :  { %35 = vperm.xlu0 %62, %v24_v1  }
  0x15   :  { %p91_p9 = pnand %p90_p8, %p84_p5 }
  0x8a   :  { %v30_v3 = vpop.permute.xlu0 %29 }
  0x8b   :  { %v32_v6 = vsub.f32 %v25_v4, %v30_v3  ;;  %v33_v7 = vsub.f32 %v26_v5, %v30_v3 }
  0x8f   :  { %v36_v8 = vpop.permute.xlu0 %35 }
  0x90   :  { %v38_v9 = vmul.f32 %v36_v8, %v32_v6  ;;  %v39_v10 = vmul.f32 %v36_v8, %v33_v7 }
  0x92   :  { %40 = vst [vmem:[#allocation5] sm:$0xff] %v38_v9  ;;  %41 = vst [vmem:[#allocation5 + $0x8] sm:$0xff] %v39_v10 }
  0x93   :  { %94 = shalt.err (!%p91_p9)
}
  0x94   :  { %51 = dma.vmem_to_hbm [thread:$0]  %s49_s17, 256, %s137_s2, [#allocation4]  }
  0x95   :  { %105 = dma.done.wait [#allocation4], 256  }
  0x96   :  { %106 = vsyncadd [#allocation4], 4294967040 }
  0x97   :  { %55 = vsyncpa [#allocation3], 1 }
  0x98   :  { %56 = vsyncpa [#allocation4], 1 }

</bundles_post_ra>
